<compile_context>
chip_gen: v6e
topology: v6e:2x2x1
jax: 0.10.0
libtpu: 0.0.40
codegen_flags: <defaults>
</compile_context>

<pallas_src>
import jax
import jax.numpy as jnp
from jax.experimental import pallas as pl
from jax.experimental.pallas import tpu as pltpu

LANE = 128  # TPU lane width


def _round_up(n, m):
    return ((n + m - 1) // m) * m


def quantmodel_kernel(x_ref, w1_ref, b1_ref, w2_ref, b2_ref, o_ref):
    # --- QuantStub: identity in un-converted eager FP32 mode ---
    x = x_ref[...]                                   # (TB, D_in) bf16

    # --- inner model: Linear -> ReLU -> Linear ---
    # MXU matmuls with bf16 inputs, f32 accumulation; bias + ReLU on the VPU in
    # f32 (v5e VPU has no bf16).
    h = jnp.dot(x, w1_ref[...], preferred_element_type=jnp.float32)
    h = jnp.maximum(h + b1_ref[...], 0.0)
    y = jnp.dot(h.astype(w2_ref.dtype), w2_ref[...],
                preferred_element_type=jnp.float32)
    y = y + b2_ref[...]

    # --- DeQuantStub: identity in un-converted eager FP32 mode ---
    o_ref[...] = y.astype(o_ref.dtype)
    # TODO(synk): post-convert() int8 quantized-linear semantics (per-tensor
    # affine activation quant + int8 weights) are not modeled; note v7x MXU has
    # no int8 path (fp8 only), so that branch must dequantize to bf16 there.


def prepare_quant_model_params(w1, b1, w2, b2, *, compute_dtype=jnp.bfloat16):
    """One-time parameter prep (hoisted out of the per-forward path).

    Casts weights to the MXU compute dtype and zero-pads only the hidden dim to
    128 lanes (exact: padded hidden columns give ReLU(0)=0 and contribute
    nothing). Input/output feature dims stay unpadded to keep HBM traffic small.
    """
    d_in, d_hid = w1.shape
    d_out = w2.shape[1]
    d_hid_p = _round_up(d_hid, LANE)

    w1p = jnp.zeros((d_in, d_hid_p), compute_dtype)
    w1p = w1p.at[:, :d_hid].set(w1.astype(compute_dtype))
    b1p = jnp.zeros((1, d_hid_p), jnp.float32)
    b1p = b1p.at[:, :d_hid].set(jnp.reshape(b1, (1, -1)).astype(jnp.float32))
    w2p = jnp.zeros((d_hid_p, d_out), compute_dtype)
    w2p = w2p.at[:d_hid, :].set(w2.astype(compute_dtype))
    b2p = jnp.reshape(b2, (1, -1)).astype(jnp.float32)
    return (w1p, b1p, w2p, b2p)


def quant_model_forward(x, params, *, compute_dtype=jnp.bfloat16,
                        out_dtype=None, block_b=4096, min_pallas_batch=256,
                        force_pallas=False, vmem_limit_bytes=None):
    w1p, b1p, w2p, b2p = params
    B, d_in = x.shape
    d_hid_p = w1p.shape[1]
    d_out = w2p.shape[1]
    if out_dtype is None:
        out_dtype = x.dtype

    xb = x.astype(compute_dtype)

    if not force_pallas and B < min_pallas_batch:
        # Tiny-batch fallback: XLA's fused GEMM beats pallas_call fixed cost.
        h = jnp.maximum(
            jnp.dot(xb, w1p, preferred_element_type=jnp.float32) + b1p, 0.0)
        y = jnp.dot(h.astype(compute_dtype), w2p,
                    preferred_element_type=jnp.float32) + b2p
        return y.astype(out_dtype)

    # Adaptive batch tiling: at least 2 grid steps when the batch is large
    # enough (lets ("parallel",) shard across v7x's two TensorCores) and a
    # nearly-full last tile (avoids ~2x padding waste at e.g. B = block_b + 1).
    n_tiles = max(pl.cdiv(B, block_b), 2 if B >= 16 else 1)
    tb = _round_up(pl.cdiv(B, n_tiles), 8)
    b_pad = n_tiles * tb
    if b_pad != B:
        xb = jnp.pad(xb, ((0, b_pad - B), (0, 0)))

    out = pl.pallas_call(
        quantmodel_kernel,
        out_shape=jax.ShapeDtypeStruct((b_pad, d_out), out_dtype),
        grid=(n_tiles,),
        in_specs=[
            # x: streamed per batch tile, unpadded narrow last dim (64 B/row bf16).
            pl.BlockSpec((tb, d_in), lambda i: (i, 0)),
            # Weights / biases: VMEM-resident across the whole grid.
            pl.BlockSpec((d_in, d_hid_p), lambda i: (0, 0)),
            pl.BlockSpec((1, d_hid_p), lambda i: (0, 0)),
            pl.BlockSpec((d_hid_p, d_out), lambda i: (0, 0)),
            pl.BlockSpec((1, d_out), lambda i: (0, 0)),
        ],
        # Output: only the real d_out columns (no 128-lane f32 slab).
        out_specs=pl.BlockSpec((tb, d_out), lambda i: (i, 0)),
        compiler_params=pltpu.CompilerParams(
            dimension_semantics=("parallel",),
            vmem_limit_bytes=vmem_limit_bytes,
        ),
    )(xb, w1p, b1p, w2p, b2p)

    return out[:B] if b_pad != B else out


if __name__ == "__main__":
    key = jax.random.PRNGKey(0)
    kx, k1, kb1, k2, kb2 = jax.random.split(key, 5)

    B, D_in, D_hid, D_out = 8, 32, 64, 32

    x = jax.random.normal(kx, (B, D_in), dtype=jnp.float32)
    # Deterministic synthetic parameters (no checkpoint loading).
    w1 = jax.random.normal(k1, (D_in, D_hid), dtype=jnp.float32) * 0.1
    b1 = jax.random.normal(kb1, (1, D_hid), dtype=jnp.float32) * 0.1
    w2 = jax.random.normal(k2, (D_hid, D_out), dtype=jnp.float32) * 0.1
    b2 = jax.random.normal(kb2, (1, D_out), dtype=jnp.float32) * 0.1

    # Parameter prep done ONCE (hoisted out of the per-call path).
    params = prepare_quant_model_params(w1, b1, w2, b2)

    # Exercise the Pallas kernel (forced; B=8 would otherwise use the fallback).
    out = quant_model_forward(x, params, force_pallas=True)
    out = jax.block_until_ready(out)

    # Pure-JAX reference mirroring the kernel dtype path (identity stubs +
    # Linear/ReLU/Linear, bf16 matmul inputs, f32 accumulate/elementwise).
    ref_h = jnp.maximum(
        jnp.dot(x.astype(jnp.bfloat16), w1.astype(jnp.bfloat16),
                preferred_element_type=jnp.float32) + b1, 0.0)
    ref = jnp.dot(ref_h.astype(jnp.bfloat16), w2.astype(jnp.bfloat16),
                  preferred_element_type=jnp.float32) + b2
    assert out.shape == (B, D_out)
    assert jnp.allclose(out, ref, atol=2e-2, rtol=2e-2)

    # Sanity-check against exact FP32 semantics (looser, bf16 rounding).
    ref_f32 = jnp.maximum(x @ w1 + b1, 0.0) @ w2 + b2
    assert jnp.allclose(out, ref_f32, atol=5e-2, rtol=5e-2)

    # Tiny-batch fallback path agrees with the kernel path.
    out_fb = jax.block_until_ready(quant_model_forward(x, params))
    assert jnp.allclose(out_fb, out, atol=1e-4, rtol=1e-4)

    print("KERNEL_OK")
</pallas_src>

<mosaic_0001>
module attributes {stable_mosaic.version = 11 : i64} {
  func.func @quantmodel_kernel(%arg0: i32, %arg1: memref<8x32xbf16, #tpu.memory_space<vmem>>, %arg2: memref<32x128xbf16, #tpu.memory_space<vmem>>, %arg3: memref<1x128xf32, #tpu.memory_space<vmem>>, %arg4: memref<128x32xbf16, #tpu.memory_space<vmem>>, %arg5: memref<1x32xf32, #tpu.memory_space<vmem>>, %arg6: memref<8x32xf32, #tpu.memory_space<vmem>>) attributes {dimension_semantics = [#tpu.dimension_semantics<parallel>], iteration_bounds = array<i64: 1>, scalar_prefetch = 0 : i64, scratch_operands = 0 : i64, tpu.core_type = #tpu.core_type<tc>, window_params = [{transform_indices = @transform_0, window_bounds = array<i64: 8, 32>}, {pipeline_mode = #tpu.pipeline_mode<synchronous>, transform_indices = @transform_1, window_bounds = array<i64: 32, 128>}, {pipeline_mode = #tpu.pipeline_mode<synchronous>, transform_indices = @transform_2, window_bounds = array<i64: 1, 128>}, {pipeline_mode = #tpu.pipeline_mode<synchronous>, transform_indices = @transform_3, window_bounds = array<i64: 128, 32>}, {pipeline_mode = #tpu.pipeline_mode<synchronous>, transform_indices = @transform_4, window_bounds = array<i64: 1, 32>}, {transform_indices = @transform_5, window_bounds = array<i64: 8, 32>}]} {
    %c0 = arith.constant 0 : index
    %c0_0 = arith.constant 0 : index
    %0 = vector.load %arg1[%c0, %c0_0] : memref<8x32xbf16, #tpu.memory_space<vmem>>, vector<8x32xbf16>
    %c0_1 = arith.constant 0 : index
    %c0_2 = arith.constant 0 : index
    %1 = vector.load %arg2[%c0_1, %c0_2] : memref<32x128xbf16, #tpu.memory_space<vmem>>, vector<32x128xbf16>
    %cst = arith.constant dense<0.000000e+00> : vector<8x128xf32>
    %2 = tpu.matmul %0, %1, %cst {dimension_numbers = #tpu.dot_dimension_numbers<[1], [0], [0], [1], [0, 0, 1, 1], [], []>} : vector<8x32xbf16>, vector<32x128xbf16>, vector<8x128xf32> -> vector<8x128xf32>
    %c0_3 = arith.constant 0 : index
    %c0_4 = arith.constant 0 : index
    %3 = vector.load %arg3[%c0_3, %c0_4] : memref<1x128xf32, #tpu.memory_space<vmem>>, vector<1x128xf32>
    %4 = vector.broadcast %3 : vector<1x128xf32> to vector<8x128xf32>
    %5 = arith.addf %2, %4 : vector<8x128xf32>
    %cst_5 = arith.constant 0.000000e+00 : f32
    %6 = vector.broadcast %cst_5 : f32 to vector<8x128xf32>
    %7 = arith.maximumf %5, %6 : vector<8x128xf32>
    %8 = arith.truncf %7 : vector<8x128xf32> to vector<8x128xbf16>
    %c0_6 = arith.constant 0 : index
    %c0_7 = arith.constant 0 : index
    %9 = vector.load %arg4[%c0_6, %c0_7] : memref<128x32xbf16, #tpu.memory_space<vmem>>, vector<128x32xbf16>
    %cst_8 = arith.constant dense<0.000000e+00> : vector<8x32xf32>
    %10 = tpu.matmul %8, %9, %cst_8 {dimension_numbers = #tpu.dot_dimension_numbers<[1], [0], [0], [1], [0, 0, 1, 1], [], []>} : vector<8x128xbf16>, vector<128x32xbf16>, vector<8x32xf32> -> vector<8x32xf32>
    %c0_9 = arith.constant 0 : index
    %c0_10 = arith.constant 0 : index
    %11 = vector.load %arg5[%c0_9, %c0_10] : memref<1x32xf32, #tpu.memory_space<vmem>>, vector<1x32xf32>
    %12 = vector.broadcast %11 : vector<1x32xf32> to vector<8x32xf32>
    %13 = arith.addf %10, %12 : vector<8x32xf32>
    %c0_11 = arith.constant 0 : index
    %c0_12 = arith.constant 0 : index
    %14 = vector.load %arg6[%c0_11, %c0_12] : memref<8x32xf32, #tpu.memory_space<vmem>>, vector<8x32xf32>
    tpu.vector_store %arg6[%c0_11, %c0_12], %13 {strides = array<i32>} : memref<8x32xf32, #tpu.memory_space<vmem>>, vector<8x32xf32>,
    return
  }
  func.func @transform_0(%arg0: i32) -> (i32, i32) {
    %c0_i32 = arith.constant 0 : i32
    %c0_i32_0 = arith.constant 0 : i32
    return %arg0, %c0_i32 : i32, i32
  }
  func.func @transform_1(%arg0: i32) -> (i32, i32) {
    %c0_i32 = arith.constant 0 : i32
    %c0_i32_0 = arith.constant 0 : i32
    %c0_i32_1 = arith.constant 0 : i32
    return %c0_i32, %c0_i32_0 : i32, i32
  }
  func.func @transform_2(%arg0: i32) -> (i32, i32) {
    %c0_i32 = arith.constant 0 : i32
    %c0_i32_0 = arith.constant 0 : i32
    %c0_i32_1 = arith.constant 0 : i32
    return %c0_i32, %c0_i32_0 : i32, i32
  }
  func.func @transform_3(%arg0: i32) -> (i32, i32) {
    %c0_i32 = arith.constant 0 : i32
    %c0_i32_0 = arith.constant 0 : i32
    %c0_i32_1 = arith.constant 0 : i32
    return %c0_i32, %c0_i32_0 : i32, i32
  }
  func.func @transform_4(%arg0: i32) -> (i32, i32) {
    %c0_i32 = arith.constant 0 : i32
    %c0_i32_0 = arith.constant 0 : i32
    %c0_i32_1 = arith.constant 0 : i32
    return %c0_i32, %c0_i32_0 : i32, i32
  }
  func.func @transform_5(%arg0: i32) -> (i32, i32) {
    %c0_i32 = arith.constant 0 : i32
    %c0_i32_0 = arith.constant 0 : i32
    return %arg0, %c0_i32 : i32, i32
  }
}

</mosaic_0001>

<bundles_post_ra>
// kernel: tpu_custom_call.1
= control target key start
LH: loop header
LB: loop body
LE: loop exit
PB: predicated region body
PF: predicated region fallthrough
CT: control target
= control target key end

     0   :  { %v306_v1 = vmov 0.0   ;;  %vm307_vm0 = vmmov 0   ;;  %vm46_vm1 = vcmask 261120   ;;  %s383_s0 = inlined_call_operand.vmem [shape: bf16[8,32], index: 0, kind: input, shape index: {}]   ;;  %s384_s1 = inlined_call_operand.vmem [shape: bf16[32,128], index: 1, kind: input, shape index: {}]   ;;  %s385_s2 = inlined_call_operand.vmem [shape: f32[1,128], index: 2, kind: input, shape index: {}]   ;;  %s386_s3 = inlined_call_operand.vmem [shape: bf16[128,32], index: 3, kind: input, shape index: {}]   ;;  %s387_s4 = inlined_call_operand.vmem [shape: f32[1,32], index: 4, kind: input, shape index: {}]   ;;  %s388_s5 = inlined_call_operand.hbm [shape: f32[8,32], index: 5, kind: output, shape index: {}]  }
   0x1   :  { %v274_v0 = vld [vmem:[%s384_s1 + $0x8] sm:$0xff]   ;;  %243 = vmatprep.subr.bf16.mxu0 %v306_v1  ;;  %251 = vmatprep.subr.bf16.mxu1 %v306_v1  ;;  %v275_v2 = vld [vmem:[%s384_s1] sm:$0xff]   ;;  %v276_v3 = vld [vmem:[%s386_s3 + $0x38] sm:$0xff]  }
   0x2   :  { %244 = vmatpush3.bf16.msra.mxu0 %v274_v0  ;;  %247 = vmatprep.mubr.msk.bf16.mxu0 %vm307_vm0, %v306_v1  ;;  %v277_v4 = vld [vmem:[%s386_s3 + $0x30] sm:$0xff]   ;;  %v22_v5 = vld [vmem:[%s383_s0] sm:$0xf]  ;;  %v278_v6 = vld [vmem:[%s386_s3 + $0x28] sm:$0xff]  }
   0x3   :  { %245 = vmatprep.subr.bf16.mxu0 %v306_v1  ;;  %267 = vmatprep.mubr.msk.bf16.mxu1 %vm307_vm0, %v306_v1 }
   0x4   :  { %252 = vmatpush3.bf16.msra.mxu1 %v276_v3 }
   0x5   :  { %253 = vmatprep.subr.bf16.mxu1 %v306_v1 }
   0x6   :  { %246 = vmatpush3.bf16.msra.mxu0 %v275_v2 }
   0x8   :  { %254 = vmatpush3.bf16.msra.mxu1 %v277_v4 }
   0x9   :  { %248 = vmatmul.mubr.msk.bf16.vlgmr.msra.gmra.mxu0 %vm46_vm1, %v22_v5  ;;  %255 = vmatprep.subr.bf16.mxu1 %v306_v1 }
   0xa   :  { %10 = vsyncpa [#allocation3], 0  ;;  %v279_v7 = vld [vmem:[%s386_s3 + $0x20] sm:$0xff]   ;;  %v280_v8 = vld [vmem:[%s386_s3 + $0x18] sm:$0xff]   ;;  %s308_s17 = smov [#allocation2]  }
   0xb   :  { %v281_v9 = vld [vmem:[%s386_s3 + $0x10] sm:$0xff]   ;;  %v282_v10 = vld [vmem:[%s386_s3 + $0x8] sm:$0xff]   ;;  %v283_v11 = vld [vmem:[%s386_s3] sm:$0xff]   ;;  %s210_s18 = sshll.u32 %s308_s17, 4  ;;  %s211_s18 = int_to_ptr.vmem [resolvable:$true] %s210_s18 }
   0xc   :  { %256 = vmatpush3.bf16.msra.mxu1 %v278_v6  ;;  %v218_v12 = vld [vmem:[%s385_s2] ss:$0 sm:$0xff]  ;;  %s284_s2 = scalar_lea.vmem %s211_s18, 128  ;;  %p289_p1 = scmp.lt.s32.totalorder %s211_s18, %s211_s18 }
   0xd   :  { %257 = vmatprep.subr.bf16.mxu1 %v306_v1  ;;  %v222_v20 = vld [vmem:[%s387_s4] ss:$0 sm:$0xff]  ;;  %p285_p0 = scmp.ne.s32.totalorder %s211_s18, %s284_s2  ;;  %p290_p2 = scmp.lt.s32.totalorder %s284_s2, %s284_s2 }
   0xf   :  { %p291_p3 = por %p290_p2, %p289_p1 }
  0x10   :  { %258 = vmatpush3.bf16.msra.mxu1 %v279_v7 }
  0x11   :  { %259 = vmatprep.subr.bf16.mxu1 %v306_v1  ;;  %p292_p4 = pnand %p291_p3, %p285_p0 }
  0x14   :  { %260 = vmatpush3.bf16.msra.mxu1 %v280_v8 }
  0x15   :  { %261 = vmatprep.subr.bf16.mxu1 %v306_v1 }
  0x18   :  { %262 = vmatpush3.bf16.msra.mxu1 %v281_v9 }
  0x19   :  { %263 = vmatprep.subr.bf16.mxu1 %v306_v1 }
  0x1c   :  { %264 = vmatpush3.bf16.msra.mxu1 %v282_v10 }
  0x1d   :  { %265 = vmatprep.subr.bf16.mxu1 %v306_v1 }
  0x20   :  { %266 = vmatpush3.bf16.msra.mxu1 %v283_v11 }
  0xc9   :  { %v84_v13 = vpop.f32.mrf.mxu0 }
  0xca   :  { %v85_v14 = vadd.f32 %v218_v12, %v84_v13 }
  0xcb   :  { %v249_v15 = vpop.f32.mrf.mxu0 }
  0xcc   :  { %v90_v16 = vmax.f32 %v85_v14, 0.0 }
  0xcd   :  { %v87_v17 = vpop.f32.mrf.mxu0 }
  0xce   :  { %v91_v18 = vpack.c.bf16 %v90_v16, %v90_v16 }
  0xcf   :  { %v250_v19 = vpop.f32.mrf.mxu0 }
  0xd0   :  { %268 = vmatmul.mubr.bf16.vlgmr.msra.gmra.mxu1 %v91_v18 }
 0x190   :  { %v197_v21 = vpop.f32.mrf.mxu1 }
 0x191   :  { %v198_v22 = vadd.f32 %v222_v20, %v197_v21 }
 0x192   :  { %v269_v23 = vpop.f32.mrf.mxu1 }
 0x193   :  { %203 = vst.msk [vmem:[#allocation2] sm:$0xff] %vm46_vm1, %v198_v22 }
 0x194   :  { %v200_v24 = vpop.f32.mrf.mxu1 }
 0x195   :  { %295 = shalt.err (!%p292_p4)
}
 0x196   :  { %213 = dma.vmem_to_hbm [thread:$0]  %s211_s18, 128, %s388_s5, [#allocation3]   ;;  %v270_v25 = vpop.f32.mrf.mxu1 }
 0x197   :  { %304 = dma.done.wait [#allocation3], 128  }
 0x198   :  { %305 = vsyncadd [#allocation3], 4294967168 }
 0x199   :  { %217 = vsyncpa [#allocation3], 1 }

</bundles_post_ra>
